<compile_context>
chip_gen: v5e
topology: v5e:2x2
jax: 0.10.0
libtpu: 0.0.40
codegen_flags: <defaults>
</compile_context>

<pallas_src>
import jax
import jax.numpy as jnp
from jax import lax
from jax.experimental import pallas as pl
from jax.experimental.pallas import tpu as pltpu


def _dot_attn_kernel(q_ref, k_ref, v_ref, mask_ref, o_ref):
    # One grid step == one (batch, snippet) pair.
    q = q_ref[0]          # (Q, E)
    k = k_ref[0, 0]       # (L, E)
    v = v_ref[0, 0]       # (L, E)
    m = mask_ref[0, 0].astype(jnp.int32)   # (1, L), nonzero where valid

    # scores: (Q, L) -- contract E of q against E of k, no explicit transpose.
    s = lax.dot_general(
        q, k,
        dimension_numbers=(((1,), (1,)), ((), ())),
        preferred_element_type=jnp.float32,
    )

    # PyTorch: attn = attn - (~mask) * 1e12
    bias = jnp.where(m != 0, 0.0, 1e12)     # (1, L) float32
    s = s - bias

    # softmax over len_snippet (dim=3 in the PyTorch code)
    s = s - jnp.max(s, axis=-1, keepdims=True)
    p = jnp.exp(s)
    w = p * pl.reciprocal(jnp.sum(p, axis=-1, keepdims=True), approx=False)

    # weighted sum of values: one contiguous, lane-dense (Q, E) store.
    o_ref[0, 0] = jnp.dot(w, v, preferred_element_type=jnp.float32).astype(o_ref.dtype)


def dot_attn(q, k, v, mask):
    """Pallas implementation of DotAttn.forward. Returns (B, Q, N, E) float32."""
    b, q_len, e_dim = q.shape
    _, num_snip, len_snip, _ = k.shape

    # 1 byte/elem mask; reshape so the BlockSpec's last two dims equal full dims.
    mask_i8 = mask.astype(jnp.int8).reshape(b, num_snip, 1, len_snip)

    out_nqe = pl.pallas_call(
        _dot_attn_kernel,
        out_shape=jax.ShapeDtypeStruct((b, num_snip, q_len, e_dim), jnp.float32),
        grid_spec=pltpu.PrefetchScalarGridSpec(
            num_scalar_prefetch=0,
            grid=(b, num_snip),
            in_specs=[
                # q block index is invariant along the inner snippet axis
                # -> DMA'd once per batch element.
                pl.BlockSpec((1, q_len, e_dim), lambda i, n: (i, 0, 0)),
                pl.BlockSpec((1, 1, len_snip, e_dim), lambda i, n: (i, n, 0, 0)),
                pl.BlockSpec((1, 1, len_snip, e_dim), lambda i, n: (i, n, 0, 0)),
                pl.BlockSpec((1, 1, 1, len_snip), lambda i, n: (i, n, 0, 0)),
            ],
            out_specs=pl.BlockSpec(
                (1, 1, q_len, e_dim), lambda i, n: (i, n, 0, 0)
            ),
        ),
        compiler_params=pltpu.CompilerParams(
            dimension_semantics=("parallel", "parallel"),
        ),
    )(q, k, v, mask_i8)

    # (B, N, Q, E) -> (B, Q, N, E): cheap wrapper transpose keeps kernel stores
    # lane-dense (output last dim is E inside the kernel).
    return jnp.transpose(out_nqe, (0, 2, 1, 3))


def dot_attn_ref(q, k, v, mask):
    """Pure-JAX mirror of the PyTorch forward (for correctness check)."""
    b, Q, E = q.shape
    _, N, L, _ = k.shape
    trans_k = jnp.transpose(k, (0, 3, 1, 2)).reshape(b, E, N * L)
    attn = jnp.einsum("bqe,bem->bqm", q, trans_k).reshape(b, Q, N, L)
    bias = (1.0 - mask.astype(jnp.float32)) * 1000000000000.0
    attn = attn - bias[:, None, :, :]
    attn = jax.nn.softmax(attn, axis=3)
    return jnp.einsum("bqnl,bnle->bqne", attn, v)


if __name__ == "__main__":
    key = jax.random.PRNGKey(0)
    kq, kk, kv, km = jax.random.split(key, 4)

    B, Q, N, L, E = 2, 8, 4, 8, 32
    q = jax.random.normal(kq, (B, Q, E), dtype=jnp.float32)
    k = jax.random.normal(kk, (B, N, L, E), dtype=jnp.float32)
    v = jax.random.normal(kv, (B, N, L, E), dtype=jnp.float32)
    mask = jax.random.bernoulli(km, 0.7, (B, N, L))
    # keep at least one valid position per snippet so softmax is well-defined
    mask = mask.at[:, :, 0].set(True)

    out = jax.block_until_ready(jax.jit(dot_attn)(q, k, v, mask))
    ref = dot_attn_ref(q, k, v, mask)

    assert out.shape == (B, Q, N, E), out.shape
    assert jnp.allclose(out, ref, atol=1e-4, rtol=1e-4), float(
        jnp.max(jnp.abs(out - ref))
    )
    print("KERNEL_OK")
</pallas_src>

<mosaic_0001>
module attributes {stable_mosaic.version = 11 : i64} {
  func.func @_dot_attn_kernel(%arg0: i32, %arg1: i32, %arg2: memref<1x8x32xf32, #tpu.memory_space<vmem>>, %arg3: memref<1x1x8x32xf32, #tpu.memory_space<vmem>>, %arg4: memref<1x1x8x32xf32, #tpu.memory_space<vmem>>, %arg5: memref<1x1x1x8xi8, #tpu.memory_space<vmem>>, %arg6: memref<1x1x8x32xf32, #tpu.memory_space<vmem>>) attributes {dimension_semantics = [#tpu.dimension_semantics<parallel>, #tpu.dimension_semantics<parallel>], iteration_bounds = array<i64: 2, 4>, scalar_prefetch = 0 : i64, scratch_operands = 0 : i64, tpu.core_type = #tpu.core_type<tc>, window_params = [{transform_indices = @transform_0, window_bounds = array<i64: 1, 8, 32>}, {transform_indices = @transform_1, window_bounds = array<i64: 1, 1, 8, 32>}, {transform_indices = @transform_2, window_bounds = array<i64: 1, 1, 8, 32>}, {transform_indices = @transform_3, window_bounds = array<i64: 1, 1, 1, 8>}, {transform_indices = @transform_4, window_bounds = array<i64: 1, 1, 8, 32>}]} {
    %c0 = arith.constant 0 : index
    %c0_0 = arith.constant 0 : index
    %c0_1 = arith.constant 0 : index
    %0 = vector.load %arg2[%c0, %c0_0, %c0_1] : memref<1x8x32xf32, #tpu.memory_space<vmem>>, vector<1x8x32xf32>
    %1 = vector.shape_cast %0 : vector<1x8x32xf32> to vector<8x32xf32>
    %c0_2 = arith.constant 0 : index
    %c0_3 = arith.constant 0 : index
    %c0_4 = arith.constant 0 : index
    %c0_5 = arith.constant 0 : index
    %2 = vector.load %arg3[%c0_2, %c0_3, %c0_4, %c0_5] : memref<1x1x8x32xf32, #tpu.memory_space<vmem>>, vector<1x1x8x32xf32>
    %3 = vector.shape_cast %2 : vector<1x1x8x32xf32> to vector<8x32xf32>
    %c0_6 = arith.constant 0 : index
    %c0_7 = arith.constant 0 : index
    %c0_8 = arith.constant 0 : index
    %c0_9 = arith.constant 0 : index
    %4 = vector.load %arg4[%c0_6, %c0_7, %c0_8, %c0_9] : memref<1x1x8x32xf32, #tpu.memory_space<vmem>>, vector<1x1x8x32xf32>
    %5 = vector.shape_cast %4 : vector<1x1x8x32xf32> to vector<8x32xf32>
    %c0_10 = arith.constant 0 : index
    %c0_11 = arith.constant 0 : index
    %c0_12 = arith.constant 0 : index
    %c0_13 = arith.constant 0 : index
    %6 = vector.load %arg5[%c0_10, %c0_11, %c0_12, %c0_13] : memref<1x1x1x8xi8, #tpu.memory_space<vmem>>, vector<1x1x1x8xi8>
    %7 = vector.shape_cast %6 : vector<1x1x1x8xi8> to vector<1x8xi8>
    %8 = arith.extsi %7 : vector<1x8xi8> to vector<1x8xi32>
    %cst = arith.constant dense<0.000000e+00> : vector<8x8xf32>
    %9 = tpu.matmul %1, %3, %cst {dimension_numbers = #tpu.dot_dimension_numbers<[1], [1], [0], [0], [0, 0, 1, 0], [], []>} : vector<8x32xf32>, vector<8x32xf32>, vector<8x8xf32> -> vector<8x8xf32>
    %c0_i32 = arith.constant 0 : i32
    %10 = vector.broadcast %c0_i32 : i32 to vector<1x8xi32>
    %11 = arith.cmpi ne, %8, %10 : vector<1x8xi32>
    %cst_14 = arith.constant 0.000000e+00 : f32
    %cst_15 = arith.constant 9.99999995E+11 : f32
    %12 = vector.broadcast %cst_14 : f32 to vector<1x8xf32>
    %13 = vector.broadcast %cst_15 : f32 to vector<1x8xf32>
    %14 = arith.select %11, %12, %13 : vector<1x8xi1>, vector<1x8xf32>
    %15 = vector.broadcast %14 : vector<1x8xf32> to vector<8x8xf32>
    %16 = arith.subf %9, %15 : vector<8x8xf32>
    %cst_16 = arith.constant dense<0xFF800000> : vector<8xf32>
    %17 = vector.multi_reduction <maximumf>, %16, %cst_16 [1] : vector<8x8xf32> to vector<8xf32>
    %18 = vector.shape_cast %17 : vector<8xf32> to vector<8x1xf32>
    %19 = vector.broadcast %18 : vector<8x1xf32> to vector<8x8xf32>
    %20 = arith.subf %16, %19 : vector<8x8xf32>
    %21 = math.exp %20 : vector<8x8xf32>
    %cst_17 = arith.constant dense<0.000000e+00> : vector<8xf32>
    %22 = vector.multi_reduction <add>, %21, %cst_17 [1] : vector<8x8xf32> to vector<8xf32>
    %23 = vector.shape_cast %22 : vector<8xf32> to vector<8x1xf32>
    %24 = tpu.reciprocal %23 : vector<8x1xf32> -> vector<8x1xf32>
    %25 = vector.broadcast %24 : vector<8x1xf32> to vector<8x8xf32>
    %26 = arith.mulf %21, %25 : vector<8x8xf32>
    %cst_18 = arith.constant dense<0.000000e+00> : vector<8x32xf32>
    %27 = tpu.matmul %26, %5, %cst_18 {dimension_numbers = #tpu.dot_dimension_numbers<[1], [0], [0], [1], [0, 0, 1, 1], [], []>} : vector<8x8xf32>, vector<8x32xf32>, vector<8x32xf32> -> vector<8x32xf32>
    %c0_19 = arith.constant 0 : index
    %c0_20 = arith.constant 0 : index
    %c0_21 = arith.constant 0 : index
    %c0_22 = arith.constant 0 : index
    %28 = vector.load %arg6[%c0_19, %c0_20, %c0_21, %c0_22] : memref<1x1x8x32xf32, #tpu.memory_space<vmem>>, vector<1x1x8x32xf32>
    %29 = vector.shape_cast %28 : vector<1x1x8x32xf32> to vector<8x32xf32>
    %30 = vector.shape_cast %27 : vector<8x32xf32> to vector<1x1x8x32xf32>
    tpu.vector_store %arg6[%c0_19, %c0_20, %c0_21, %c0_22], %30 {strides = array<i32>} : memref<1x1x8x32xf32, #tpu.memory_space<vmem>>, vector<1x1x8x32xf32>,
    return
  }
  func.func @transform_0(%arg0: i32, %arg1: i32) -> (i32, i32, i32) {
    %c0_i32 = arith.constant 0 : i32
    %c0_i32_0 = arith.constant 0 : i32
    %c0_i32_1 = arith.constant 0 : i32
    return %arg0, %c0_i32, %c0_i32_0 : i32, i32, i32
  }
  func.func @transform_1(%arg0: i32, %arg1: i32) -> (i32, i32, i32, i32) {
    %c0_i32 = arith.constant 0 : i32
    %c0_i32_0 = arith.constant 0 : i32
    %c0_i32_1 = arith.constant 0 : i32
    return %arg0, %arg1, %c0_i32, %c0_i32_0 : i32, i32, i32, i32
  }
  func.func @transform_2(%arg0: i32, %arg1: i32) -> (i32, i32, i32, i32) {
    %c0_i32 = arith.constant 0 : i32
    %c0_i32_0 = arith.constant 0 : i32
    %c0_i32_1 = arith.constant 0 : i32
    return %arg0, %arg1, %c0_i32, %c0_i32_0 : i32, i32, i32, i32
  }
  func.func @transform_3(%arg0: i32, %arg1: i32) -> (i32, i32, i32, i32) {
    %c0_i32 = arith.constant 0 : i32
    %c0_i32_0 = arith.constant 0 : i32
    %c0_i32_1 = arith.constant 0 : i32
    return %arg0, %arg1, %c0_i32, %c0_i32_0 : i32, i32, i32, i32
  }
  func.func @transform_4(%arg0: i32, %arg1: i32) -> (i32, i32, i32, i32) {
    %c0_i32 = arith.constant 0 : i32
    %c0_i32_0 = arith.constant 0 : i32
    %c0_i32_1 = arith.constant 0 : i32
    return %arg0, %arg1, %c0_i32, %c0_i32_0 : i32, i32, i32, i32
  }
}

</mosaic_0001>

<bundles_post_ra>
// kernel: dot_attn.1
= control target key start
LH: loop header
LB: loop body
LE: loop exit
PB: predicated region body
PF: predicated region fallthrough
CT: control target
= control target key end

     0   :  { %s1156_s0 = inlined_call_operand.hbm [shape: f32[2,8,32], index: 0, kind: input, shape index: {}]   ;;  %s1157_s1 = inlined_call_operand.hbm [shape: f32[2,4,8,32], index: 1, kind: input, shape index: {}]   ;;  %s1158_s2 = inlined_call_operand.hbm [shape: f32[2,4,8,32], index: 2, kind: input, shape index: {}]   ;;  %s1159_s3 = inlined_call_operand.vmem [shape: s8[2,4,1,8], index: 3, kind: input, shape index: {}]   ;;  %s1160_s4 = inlined_call_operand.vmem [shape: f32[2,4,8,32], index: 4, kind: output, shape index: {}]  }
   0x1   :  { %1166 = sst [smem:[#allocation14_spill]] %s1157_s1 }
   0x2   :  { %1167 = sst [smem:[#allocation15_spill]] %s1158_s2 }
   0x3   :  { %9 = vsyncpa [#allocation3], 0 }
   0x4   :  { %11 = vsyncpa [#allocation3 + $0x1], 0 }
   0x5   :  { %12 = vsyncpa [#allocation5], 0 }
   0x6   :  { %14 = vsyncpa [#allocation5 + $0x1], 0  ;;  %s933_s15 = smov 0   ;;  %s935_s16 = smov 0  }
   0x7   :  { %s937_s17 = smov 0   ;;  %s939_s18 = smov 0  }
   0x8   :  { %s941_s19 = smov 0   ;;  %s943_s20 = smov 0  }
   0x9   :  { %s945_s21 = smov 0   ;;  %s947_s22 = smov 0  }
   0xa   :  { %s949_s23 = smov 0   ;;  %s951_s24 = smov 0  }
   0xb   :  { %s953_s25 = smov 0  }
   0xc LB: > { %1168 = sst [smem:[#allocation9_spill]] %s897_s23  ;;  %s1161_s26 = sadd.s32 4294967295, %s905_s25   ;;  %s905_s25 = sphi %s953_s25, %s20_s25   ;;  %s901_s24 = sphi %s951_s24, %s1186_s24   ;;  %s897_s23 = sphi %s949_s23, %s1185_s23   ;;  %s893_s22 = sphi %s947_s22, %s1184_s22   ;;  %s889_s21 = sphi %s945_s21, %s1183_s21   ;;  %s885_s20 = sphi %s943_s20, %s1192_s20   ;;  %s881_s19 = sphi %s941_s19, %s1191_s19   ;;  %s877_s18 = sphi %s939_s18, %s1190_s18   ;;  %s873_s17 = sphi %s937_s17, %s1189_s17   ;;  %s869_s16 = sphi %s935_s16, %s1188_s16   ;;  %s865_s15 = sphi %s933_s15, %s1187_s15  }
   0xd   : > { %1169 = sst [smem:[#allocation10_spill]] %s901_s24  ;;  %s29_s27 = sadd.s32 1, %s897_s23 }
   0xe   : > { %p30_p0 = scmp.ge.s32.totalorder %s29_s27, 4  ;;  %s32_s28 = sadd.s32 1, %s901_s24 }
   0xf   : > { %p47_p1 = scmp.eq.s32.totalorder %s905_s25, 0  ;;  %p992_p2 = scmp.eq.s32.totalorder %s1161_s26, 0 }
  0x10   : > { %s1194_s27 = smov (%p30_p0, %s29_s27), 0  ;;  %s1196_s28 = smov (!%p30_p0, %s32_s28), %s901_s24 }
  0x11   : > { %1171 = sst [smem:[#allocation11_spill]] %s1194_s27  ;;  %s63_s30 = ssub.s32 %s897_s23, %s1194_s27 }
  0x12   : > { %s67_s5 = sadd.s32 1, %s873_s17  ;;  %p34_p3 = scmp.ge.s32.totalorder %s1196_s28, 2 }
  0x13   : > { %p74_p4 = scmp.ne.s32.totalorder %s873_s17, %s869_s16  ;;  %p80_p5 = scmp.ne.s32.totalorder %s869_s16, %s865_s15 }
  0x14   : > { %s1198_s28 = smov (%p34_p3, %s1196_s28), 0  ;;  %p627_p8 = scmp.lt.s32.totalorder %s905_s25, 8 }
  0x15   : > { %1172 = sst [smem:[#allocation12_spill]] %s1198_s28  ;;  %p1009_p6 = por %p74_p4, %p47_p1 }
  0x16   : > { %p1015_p7 = por %p80_p5, %p992_p2  ;;  %s36_s8 = ssub.s32 %s901_s24, %s1198_s28 }
  0x17   : > { %p37_p9 = scmp.eq.s32.totalorder %s36_s8, 0  ;;  %s64_s9 = sor.u32 %s63_s30, %s36_s8 }
  0x18   : > { %p65_p10 = scmp.eq.s32.totalorder %s64_s9, 0  ;;  %s207_s10 = sand.u32 1, %s905_s25  }
  0x19   : > { %s209_s11 = sand.u32 1, %s873_s17   ;;  %s594_s14 = sshll.u32 %s901_s24, 2 }
  0x1a   : > { %s1025_s12 = scalar_select %p65_p10, %s873_s17, %s67_s5  }
  0x1b   : > { %s1027_s13 = sshll.u32 %s209_s11, 3  ;;  %s215_s15 = sadd.s32 %s897_s23, %s594_s14 }
  0x1c   : > { %s595_s26 = sshll.u32 %s215_s15, 3  ;;  %s211_s28 = scalar_lea.vmem [#allocation4], %s1027_s13 }
  0x1d   : > { %s221_s30 = sshll.u32 %s211_s28, 4  ;;  %s1175_s1 = sld [smem:[#allocation14_spill]]  ;;  %s222_s30 = int_to_ptr.vmem [resolvable:$true] %s221_s30 }
  0x1e   : > { %p1039_p11 = pnand %p627_p8, %p1009_p6  ;;  %s1177_s2 = sld [smem:[#allocation15_spill]] }
  0x1f   : > { %s1046_s27 = scalar_lea.sflag [#allocation5], %s207_s10  ;;  %p599_p12 = scmp.ge.s32.totalorder %s905_s25, 1 }
  0x20   : > { %p257_p13 = scmp.lt.s32.totalorder %s905_s25, 9  ;;  %s39_s9 = sadd.s32 1, %s885_s20 }
  0x21   : > { %p46_p3 = scmp.ne.s32.totalorder %s885_s20, %s881_s19  ;;  %p52_p4 = scmp.ne.s32.totalorder %s881_s19, %s877_s18 }
  0x22   : > { %p1053_p0 = pnand %p599_p12, %p257_p13  ;;  %s592_s10 = sshll.u32 %s901_s24, 3 }
  0x23   : > { %s217_s5 = scalar_lea.hbm %s1175_s1, %s595_s26  ;;  %p48_p5 = por %p47_p1, %p46_p3 }
  0x24   : > { %s219_s11 = sshll.u32 %s217_s5, 4  ;;  %s238_s23 = scalar_lea.hbm %s1177_s2, %s595_s26  ;;  %s220_s11 = int_to_ptr.hbm [resolvable:$true] %s219_s11 }
  0x25   : > { %623 = dma.hbm_to_vmem [thread:$0]  (!%p1039_p11), %s220_s11, 128, %s222_s30, %s1046_s27  }
  0x26   : > { %s1060_s5 = scalar_select %p37_p9, %s885_s20, %s39_s9  }
  0x27   : > { %s188_s26 = sand.u32 1, %s885_s20   ;;  %p1072_p6 = por %p992_p2, %p52_p4 }
  0x28   : > { %1179 = sst [smem:[#allocation13_spill]] %s1060_s5  ;;  %s591_s11 = sshll.u32 %s188_s26, 3 }
  0x29   : > { %s196_s8 = scalar_lea.hbm %s1156_s0, %s592_s10  ;;  %s192_s1 = scalar_lea.vmem [#allocation2], %s591_s11 }
  0x2a   : > { %s198_s9 = sshll.u32 %s196_s8, 4  ;;  %s200_s2 = sshll.u32 %s192_s1, 4  ;;  %s199_s9 = int_to_ptr.hbm [resolvable:$true] %s198_s9  ;;  %s201_s2 = int_to_ptr.vmem [resolvable:$true] %s200_s2 }
  0x2b   : > { %p618_p9 = pnand %p627_p8, %p48_p5  ;;  %s240_s18 = sshll.u32 %s238_s23, 4  ;;  %s241_s18 = int_to_ptr.hbm [resolvable:$true] %s240_s18 }
  0x2c   : > { %s232_s29 = scalar_lea.vmem [#allocation6], %s1027_s13  ;;  %s189_s5 = scalar_lea.sflag [#allocation3], %s188_s26 }
  0x2d   : > { %s242_s24 = sshll.u32 %s232_s29, 4  ;;  %261 = sbr.rel (%p1053_p0) target bundleno = 579 (0x243), region = 36  ;;  %s243_s24 = int_to_ptr.vmem [resolvable:$true] %s242_s24 }
  0x2e   : > { %620 = dma.hbm_to_vmem [thread:$0]  (!%p618_p9), %s199_s9, 128, %s201_s2, %s189_s5  }
  0x2f   : > { %626 = dma.hbm_to_vmem [thread:$0]  (!%p1039_p11), %s241_s18, 128, %s243_s24, %s1046_s27  }
  0x30   : > { %s263_s10 = sand.u32 (!%p1053_p0), 1, %s881_s19  }
  0x31   : > { %s600_s1 = sshll.u32 (!%p1053_p0), %s263_s10, 3  ;;  %s264_s11 = scalar_lea.sflag (!%p1053_p0), [#allocation3], %s263_s10 }
  0x32   : > { %s267_s15 = scalar_lea.vmem [#allocation2], %s600_s1 }
  0x33   : > { %856 = dma.done.wait (%p1072_p6), %s264_s11, 128  }
  0x34   : > { %858 = vsyncadd (%p1072_p6), %s264_s11, 4294967168  ;;  %s1181_s23 = sadd.s32 4294967295, %s905_s25   ;;  %s275_s24 = sand.u32 1, %s869_s16  }
  0x35   : > { %s273_s2 = sand.u32 1, %s1181_s23   ;;  %s1095_s13 = sshll.u32 %s275_s24, 3 }
  0x36   : > { %s274_s14 = scalar_lea.sflag [#allocation5], %s273_s2  ;;  %s277_s27 = scalar_lea.vmem [#allocation4], %s1095_s13 }
  0x37   : > { %860 = dma.done.wait (%p1015_p7), %s274_s14, 256  }
  0x38   : > { %862 = vsyncadd (%p1015_p7), %s274_s14, 4294967040  ;;  %vm353_vm0 = vcmask 261120   ;;  %v349_v0 = vld [vmem:[%s277_s27] sm:$0xff]  ;;  %v348_v1 = vld [vmem:[%s267_s15] sm:$0xff]  ;;  %p333_p1 = scmp.lt.s32.totalorder %s893_s22, 1  ;;  %p335_p2 = scmp.lt.s32.totalorder %s889_s21, 3 }
  0x39   : > { %606 = vmatpush.xpose.msk.msra.mxu0 %vm353_vm0, %v349_v0  ;;  %v907_v4 = vmov 1e+12   ;;  %vm384_vm2 = vcmask 64512  }
  0x3a   : > { %s1200_s22 = smov (!%p333_p1, %s893_s22), 1  ;;  %s1202_s21 = smov (!%p335_p2, %s889_s21), 3 }
  0x3b   : > { %s603_s6 = sshll.u32 %s1200_s22, 2 }
  0x3c   : > { %607 = vmatmul.msk.f32.vlgmr.msra.gmra.mxu0 %vm353_vm0, %v348_v1  ;;  %s1108_s5 = sadd.s32 %s603_s6, %s1202_s21  ;;  %s287_s21 = scalar_lea.vmem [#allocation6], %s1095_s13 }
  0x3d   : > { %s339_s30 = scalar_lea.vmem %s1159_s3, %s1108_s5  ;;  %v350_v15 = vld [vmem:[%s287_s21] sm:$0xff]  ;;  %s605_s22 = sshll.u32 %s1108_s5, 3 }
  0x3e   : > { %v351_v2 = vld [vmem:[%s339_s30] sm:$0x1]  ;;  %427 = vmatpush.msra.mxu1 %v350_v15  ;;  %s347_s9 = scalar_lea.vmem %s1160_s4, %s605_s22 }
  0x3f   : > { %v352_v3 = vunpack.c.0.s8 %v351_v2 }
  0x41   : > { %vm380_vm1 = vcmp.ne.s32.totalorder %v352_v3, 0 }
  0x42   : > { %v381_v5 = vsel %vm380_vm1, 0.0, %v907_v4 }
  0x43   : > { %v382_v6 = vperm.slane %v381_v5, 0 }
  0xb9   : > { %v377_v7 = vpop.f32.mrf.mxu0 }
  0xba   : > { %v383_v8 = vsub.f32 %v377_v7, %v382_v6 }
  0xbc   : > { %v385_v9 = vsel %vm384_vm2, %v383_v8, -inf }
  0xbd   : > { %386 = vmax.xlane.f32.xlu0 %v385_v9 }
 0x130   : > { %v387_v10 = vpop.xlane.xlu0 %386 }
 0x131   : > { %v388_v11 = vsub.f32 %v383_v8, %v387_v10 }
 0x133   : > { %v389_v12 = vmul.f32 1.442695, %v388_v11 }
 0x135   : > { %717 = vpow2.f32 %v389_v12 }
 0x13b   : > { %v718_v13 = vpop.eup %717 }
 0x13c   : > { %v391_v14 = vsel %vm384_vm2, %v718_v13, 0.0 }
 0x13d   : > { %392 = vadd.xlane.f32.xlu0 %v391_v14 }
 0x1b0   : > { %v393_v16 = vpop.xlane.xlu0 %392 }
 0x1b1   : > { %719 = vrcp.f32 %v393_v16  ;;  %v405_v20 = vand.u32 2147483648, %v393_v16  ;;  %v403_v22 = vand.u32 2147483647, %v393_v16  ;;  %vm399_vm4 = vweird.f32 %v393_v16 }
 0x1b3   : > { %v406_v24 = vor.u32 1.1754944e-38, %v405_v20  ;;  %vm404_vm6 = vcmp.eq.f32.partialorder %v403_v22, 8.507059e+37 }
 0x1b7   : > { %v720_v17 = vpop.eup %719 }
 0x1b8   : > { %v395_v18 = vmul.f32 %v720_v17, %v393_v16  ;;  %vm400_vm3 = vweird.f32 %v720_v17 }
 0x1b9   : > { %vm401_vm5 = vmor %vm399_vm4, %vm400_vm3 }
 0x1ba   : > { %v396_v19 = vsub.f32 1.0, %v395_v18 }
 0x1bc   : > { %v397_v21 = vmul.f32 %v720_v17, %v396_v19 }
 0x1be   : > { %v398_v23 = vadd.f32 %v720_v17, %v397_v21 }
 0x1c0   : > { %v402_v25 = vsel %vm401_vm5, %v720_v17, %v398_v23 }
 0x1c1   : > { %v407_v26 = vsel %vm404_vm6, %v406_v24, %v402_v25 }
 0x1c2   : > { %v408_v27 = vmul.f32 %v718_v13, %v407_v26 }
 0x1c4   : > { %608 = vmatmul.msk.f32.vlgmr.msra.gmra.mxu1 %vm384_vm2, %v408_v27 }
 0x241   : > { %v429_v28 = vpop.f32.mrf.mxu1 }
 0x242   : > { %432 = vst.msk [vmem:[%s347_s9] sm:$0xff] %vm353_vm0, %v429_v28 }
 0x243 PF: > { %s20_s25 = sadd.s32 1, %s905_s25   ;;  %s1182_s29 = sld [smem:[#allocation13_spill]] }
 0x244   : > { %p17_p7 = scmp.ge.s32.totalorder %s20_s25, 10   ;;  %s1183_s21 = sld [smem:[#allocation9_spill]] }
 0x245   : > { %s1184_s22 = sld [smem:[#allocation10_spill]]  ;;  %s1187_s15 = smov %s869_s16 }
 0x246   : > { %s1185_s23 = sld [smem:[#allocation11_spill]]  ;;  %s1188_s16 = smov %s873_s17 }
 0x247   : > { %s1186_s24 = sld [smem:[#allocation12_spill]]  ;;  %s1189_s17 = smov %s1025_s12 }
 0x248   : > { %s1190_s18 = smov %s881_s19  ;;  %s1191_s19 = smov %s885_s20 }
 0x249   : > { %s1192_s20 = smov %s1182_s29  ;;  %19 = sbr.rel (!%p17_p7) target bundleno = 12 (0xc), region = 103 }
 0x24e   :  { %460 = vsyncpa [#allocation3], 1 }
 0x24f   :  { %462 = vsyncpa [#allocation3 + $0x1], 1 }
 0x250   :  { %463 = vsyncpa [#allocation5], 1 }
 0x251   :  { %465 = vsyncpa [#allocation5 + $0x1], 1 }

</bundles_post_ra>
